<compile_context>
chip_gen: v7x
topology: tpu7x:2x2x1
jax: 0.10.0
libtpu: 0.0.40
codegen_flags: <defaults>
</compile_context>

<pallas_src>
import jax
import jax.numpy as jnp
from jax.experimental import pallas as pl
from jax.experimental.pallas import tpu as pltpu

# ---- hyperparameters mirroring EEGNET.__init__ ----
SAMPLE_DURATION = 500
CHANNEL_AMOUNT = 8
NUM_CLASSES = 3
RECEPTIVE_FIELD = 16
FILTER_SIZING = 8
DEPTH_MULT = 2
G = FILTER_SIZING * DEPTH_MULT           # 16
SEP_K = 16                               # separable depthwise kernel width
SEP_LEFT = (SEP_K - 1) // 2              # 7  (PyTorch 'same' for even kernels)
RF_LEFT = (RECEPTIVE_FIELD - 1) // 2     # 7
POOL = 5
T0 = SAMPLE_DURATION                     # 500
T1 = T0 // POOL                          # 100
T2 = T1 // POOL                          # 20
ENDSIZE = G * T2                         # 320 (matches nn.Linear(320, 3))

# ---- lane-friendly padded sizes ----
T0P = 512                                # time padded (cols >= 500 are exact zeros)
T1P = 128                                # pooled time padded (cols >= 100 are exact zeros)
NCP = 128                                # classes padded -> lane-dense output slab


def _elu(x):
    return jnp.where(x > 0, x, jnp.exp(jnp.minimum(x, 0.0)) - 1.0)


def _make_kernel(bb, t_shifts, d_shifts):
    """t_shifts[k]/d_shifts[k]: lane roll amounts so roll(v)[.., t] == v[.., t+k-7]."""

    def _roll(v, s, size):
        s = s % size
        return v if s == 0 else pltpu.roll(v, s, 1)

    def kernel(x_ref, wsp_ref, wt_ref, h2_ref, p1_ref, wdw_ref, wpw_ref,
               h3_ref, q_ref, mask_ref, sel_ref, em_ref, bfc_ref, out_ref):
        f32, bf16 = jnp.float32, jnp.bfloat16

        # Stage A: spatial contraction for all bb elements at once (block-diag
        # bf16 weight, M = bb*G rows), one MXU matmul.
        s = jnp.dot(wsp_ref[...], x_ref[...], preferred_element_type=f32)     # (R, T0P)

        # Stage B: temporal 1xRF 'same' conv as 16 lane rolls + VPU FMAs (f32).
        # The exact-zero time-pad columns (>= 500) make cyclic wrap == zero pad.
        conv = wt_ref[:, 0:1] * _roll(s, t_shifts[0], T0P)
        for k in range(1, RECEPTIVE_FIELD):
            conv = conv + wt_ref[:, k:k + 1] * _roll(s, t_shifts[k], T0P)
        out2 = _elu(conv + h2_ref[...])                                       # (R, T0P)

        # Stage C: avgpool1 as one MXU matmul with an exact 0/1 bf16 matrix
        # (the 1/5 factor is folded into the f32 depthwise weights).
        pool1 = jnp.dot(out2.astype(bf16), p1_ref[...],
                        preferred_element_type=f32)                           # (R, T1P)

        # Stage D: depthwise 1x16 'same' conv on pooled time, batched rolls + FMAs.
        # Zero columns >= 100 absorb the cyclic wrap (max |shift| = 8 <= 28 pad cols).
        dw = wdw_ref[:, 0:1] * _roll(pool1, d_shifts[0], T1P)
        for k in range(1, SEP_K):
            dw = dw + wdw_ref[:, k:k + 1] * _roll(pool1, d_shifts[k], T1P)

        # Stage E: pointwise 1x1 conv (block-diag, BN3 scale folded) + bias + ELU.
        out3 = _elu(jnp.dot(wpw_ref[...], dw.astype(bf16),
                            preferred_element_type=f32) + h3_ref[...])        # (R, T1P)

        # Stage F: avgpool2 + channel-major flatten + fc2.
        #   u[e*G+g, g'*NC+n] = sum_t out3[e*G+g, t] * q[t, g'*NC+n]
        u = jnp.dot(out3.astype(bf16), q_ref[...],
                    preferred_element_type=f32)                               # (R, G*NC)
        um = u * mask_ref[...]                                                # keep g'==g
        w = jnp.dot(sel_ref[...], um, preferred_element_type=f32)             # (bb, G*NC)
        logits = jnp.dot(w, em_ref[...], preferred_element_type=f32) + bfc_ref[...]
        out_ref[0, :, :] = logits                                             # one unmasked store

    return kernel


_ROLL_LIKE_JNP = None


def _roll_matches_jnp_roll():
    """pltpu.roll is expected to match jnp.roll (result[i] = x[i - shift]).  Probe it
    once at runtime (cached) so a convention difference across jax versions cannot
    silently flip the conv direction."""
    global _ROLL_LIKE_JNP
    if _ROLL_LIKE_JNP is None:
        x = jnp.arange(8 * 128, dtype=jnp.float32).reshape(8, 128)

        def probe(x_ref, o_ref):
            o_ref[...] = pltpu.roll(x_ref[...], 1, 1)

        r = pl.pallas_call(
            probe, out_shape=jax.ShapeDtypeStruct((8, 128), jnp.float32))(x)
        _ROLL_LIKE_JNP = bool(jnp.array_equal(r, jnp.roll(x, 1, axis=1)))
    return _ROLL_LIKE_JNP


def _pick_bb(B):
    # Keep nb = ceil(B/bb) >= 2 whenever B >= 2 (v7x megacore), grow bb with B
    # so the sublane-stacked operands reach 128/256 rows on real batches.
    if B >= 32:
        return 16
    if B >= 16:
        return 8
    if B >= 8:
        return 4
    if B >= 4:
        return 2
    return 1


def eegnet_forward(x, params):
    """x: (B, 1, 8, 500) float32 in NCHW like the PyTorch module.  Returns (B, 3)."""
    f32, bf16 = jnp.float32, jnp.bfloat16
    B = x.shape[0]
    x = x.astype(f32)[:, 0]                                      # (B, 8, 500)

    bb = _pick_bb(B)
    R = bb * G                                                   # stacked rows per step
    Bpad = pl.cdiv(B, bb) * bb
    nb = Bpad // bb

    # ---- raw input: zero-pad batch + time (exact zeros in cols >= 500) ----
    xb = jnp.pad(x, ((0, Bpad - B), (0, 0), (0, T0P - T0)))      # (Bpad, 8, 512)
    x_stack = xb.reshape(Bpad * CHANNEL_AMOUNT, T0P).astype(bf16)

    # ---- eval-mode BatchNorm -> per-channel affine ----
    def bn_affine(p):
        s = p["gamma"] / jnp.sqrt(p["var"] + 1e-5)
        return s.astype(f32), (p["beta"] - p["mean"] * s).astype(f32)

    s1, h1 = bn_affine(params["bn1"])                            # (F1,)
    s2, h2 = bn_affine(params["bn2"])                            # (G,)
    s3, h3 = bn_affine(params["bn3"])                            # (G,)

    fidx = jnp.arange(G) // DEPTH_MULT                           # output group -> temporal filter
    wt = params["w_temporal"].astype(f32)                        # (F1, RF)
    wsp = params["w_spatial"].astype(f32)                        # (G, 8)

    # spatial-first decomposition of temporal+BN1+spatial+BN2 (taps commute with
    # the channel contraction): s = wsp_scaled @ x ; conv = sum_k wt[k] * shift_k(s)
    wsp_scaled = (s2 * s1[fidx])[:, None] * wsp                  # (G, 8)
    h2p = s2 * h1[fidx] * wsp.sum(axis=1) + h2                   # (G,)
    eyebb = jnp.eye(bb, dtype=f32)
    wsp_bd = jnp.kron(eyebb, wsp_scaled).astype(bf16)            # (R, bb*8) block-diag
    wt_tiled = jnp.tile(wt[fidx], (bb, 1))                       # (R, RF) f32
    h2_tiled = jnp.tile(h2p[:, None], (bb, 1))                   # (R, 1)  f32

    # avgpool1 as an exact 0/1 bf16 matrix; columns >= T1 are exact zeros
    u_idx = jnp.arange(T0P)[:, None]
    s_idx = jnp.arange(T1P)[None, :]
    p1_01 = ((s_idx < T1) & (u_idx // POOL == s_idx)).astype(bf16)   # (T0P, T1P)

    # depthwise weights (1/5 from avgpool1 folded in, f32, tiled over elements)
    wdw_tiled = jnp.tile(params["w_dw"].astype(f32), (bb, 1)) / POOL  # (R, SEP_K)

    # pointwise 1x1 (+ BN3 scale) as block-diag bf16; bias tiled
    wpw_s = s3[:, None] * params["w_pw"].astype(f32)             # (G, G)
    wpw_bd = jnp.kron(eyebb, wpw_s).astype(bf16)                 # (R, R)
    h3_tiled = jnp.tile(h3[:, None], (bb, 1))                    # (R, 1)

    # avgpool2 + channel-major flatten + fc2 folded into q (1/5 included, bf16)
    t_idx = jnp.arange(T1P)[:, None]
    q_idx = jnp.arange(T2)[None, :]
    p2 = jnp.where((t_idx < T1) & (t_idx // POOL == q_idx), 1.0 / POOL, 0.0).astype(f32)
    wfc3 = params["w_fc"].reshape(NUM_CLASSES, G, T2).astype(f32)
    qmat = jnp.einsum("ts,ngs->tgn", p2, wfc3).reshape(T1P, G * NUM_CLASSES).astype(bf16)

    # epilogue selection matrices (exact 0/1) + padded bias
    jg = jnp.arange(G * NUM_CLASSES)
    mmask = (jg[None, :] // NUM_CLASSES == jnp.arange(G)[:, None]).astype(f32)   # (G, 48)
    mask_tiled = jnp.tile(mmask, (bb, 1))                                        # (R, 48)
    sel = jnp.kron(eyebb, jnp.ones((1, G), f32))                                 # (bb, R)
    em = (jg[:, None] % NUM_CLASSES == jnp.arange(NCP)[None, :]).astype(f32)     # (48, NCP)
    bfc = jnp.zeros((1, NCP), f32).at[0, :NUM_CLASSES].set(params["b_fc"].astype(f32))

    # lane shifts implementing v[:, t + k - 7] (robust to the roll convention)
    sign = 1 if _roll_matches_jnp_roll() else -1
    t_shifts = [(sign * (RF_LEFT - k)) % T0P for k in range(RECEPTIVE_FIELD)]
    d_shifts = [(sign * (SEP_LEFT - k)) % T1P for k in range(SEP_K)]

    def cspec(shape):
        return pl.BlockSpec(shape, lambda b: (0,) * len(shape))

    out = pl.pallas_call(
        _make_kernel(bb, t_shifts, d_shifts),
        out_shape=jax.ShapeDtypeStruct((nb, bb, NCP), f32),
        grid=(nb,),
        in_specs=[
            pl.BlockSpec((bb * CHANNEL_AMOUNT, T0P), lambda b: (b, 0)),
            cspec((R, bb * CHANNEL_AMOUNT)),
            cspec((R, RECEPTIVE_FIELD)),
            cspec((R, 1)),
            cspec((T0P, T1P)),
            cspec((R, SEP_K)),
            cspec((R, R)),
            cspec((R, 1)),
            cspec((T1P, G * NUM_CLASSES)),
            cspec((R, G * NUM_CLASSES)),
            cspec((bb, R)),
            cspec((G * NUM_CLASSES, NCP)),
            cspec((1, NCP)),
        ],
        out_specs=pl.BlockSpec((1, bb, NCP), lambda b: (b, 0, 0)),
        compiler_params=pltpu.CompilerParams(
            dimension_semantics=("parallel",)),
    )(x_stack, wsp_bd, wt_tiled, h2_tiled, p1_01, wdw_tiled, wpw_bd,
      h3_tiled, qmat, mask_tiled, sel, em, bfc)

    return out.reshape(Bpad, NCP)[:B, :NUM_CLASSES]              # (B, 3)


def init_params(key):
    keys = jax.random.split(key, 9)

    def nrm(k, shape, scale=0.1):
        return (scale * jax.random.normal(k, shape)).astype(jnp.float32)

    def bn(k, n):
        k1, k2, k3, k4 = jax.random.split(k, 4)
        return dict(gamma=1.0 + nrm(k1, (n,)), beta=nrm(k2, (n,)),
                    mean=nrm(k3, (n,)), var=1.0 + jnp.abs(nrm(k4, (n,))))

    return dict(
        # Conv2d(1, F1, [1, RF]) weight (F1, 1, 1, RF) -> (F1, RF)
        w_temporal=nrm(keys[0], (FILTER_SIZING, RECEPTIVE_FIELD)),
        bn1=bn(keys[1], FILTER_SIZING),
        # Conv2d(F1, G, [8, 1], groups=F1) weight (G, 1, 8, 1) -> (G, 8)
        w_spatial=nrm(keys[2], (G, CHANNEL_AMOUNT)),
        bn2=bn(keys[3], G),
        # depthwise Conv2d(G, G, [1, 16], groups=G) weight (G, 1, 1, 16) -> (G, 16)
        w_dw=nrm(keys[4], (G, SEP_K)),
        # pointwise Conv2d(G, G, [1, 1]) weight (G, G, 1, 1) -> (G, G)
        w_pw=nrm(keys[5], (G, G)),
        bn3=bn(keys[6], G),
        # Linear(320, 3)
        w_fc=nrm(keys[7], (NUM_CLASSES, ENDSIZE)),
        b_fc=nrm(keys[8], (NUM_CLASSES,)),
    )


if __name__ == "__main__":
    key = jax.random.PRNGKey(0)
    pkey, xkey = jax.random.split(key)
    params = init_params(pkey)

    B = 2
    x = jax.random.normal(xkey, (B, 1, CHANNEL_AMOUNT, SAMPLE_DURATION),
                          dtype=jnp.float32)

    out = eegnet_forward(x, params)
    out = jax.block_until_ready(out)

    assert out.shape == (B, NUM_CLASSES), out.shape
    assert bool(jnp.all(jnp.isfinite(out)))
    print("KERNEL_OK")
</pallas_src>

<mosaic_0001>
module attributes {stable_mosaic.version = 11 : i64} {
  func.func @probe(%arg0: memref<8x128xf32, #tpu.memory_space<vmem>>, %arg1: memref<8x128xf32, #tpu.memory_space<vmem>>) attributes {dimension_semantics = [], scalar_prefetch = 0 : i64, scratch_operands = 0 : i64, tpu.core_type = #tpu.core_type<tc>} {
    %c0 = arith.constant 0 : index
    %c0_0 = arith.constant 0 : index
    %0 = vector.load %arg0[%c0, %c0_0] : memref<8x128xf32, #tpu.memory_space<vmem>>, vector<8x128xf32>
    %c1_i32 = arith.constant 1 : i32
    %1 = tpu.dynamic_rotate %0 by %c1_i32 dim 1 : vector<8x128xf32>, i32 -> vector<8x128xf32>
    %c0_1 = arith.constant 0 : index
    %c0_2 = arith.constant 0 : index
    %2 = vector.load %arg1[%c0_1, %c0_2] : memref<8x128xf32, #tpu.memory_space<vmem>>, vector<8x128xf32>
    tpu.vector_store %arg1[%c0_1, %c0_2], %1 {strides = array<i32>} : memref<8x128xf32, #tpu.memory_space<vmem>>, vector<8x128xf32>,
    return
  }
}

</mosaic_0001>

<bundles_post_ra>
// kernel: tpu_custom_call.1
= control target key start
LH: loop header
LB: loop body
LE: loop exit
PB: predicated region body
PF: predicated region fallthrough
CT: control target
= control target key end

     0   :  { %6 = vsyncpa [#allocation3], 0  ;;  %s128_s0 = inlined_call_operand.hbm [shape: f32[8,128], index: 0, kind: input, shape index: {}]   ;;  %s129_s1 = inlined_call_operand.hbm [shape: f32[8,128], index: 1, kind: output, shape index: {}]  }
   0x1   :  { %7 = vsyncpa [#allocation4], 0  ;;  %s91_s6 = smov [#allocation2]   ;;  %s43_s10 = scalar_lea.hbm %s128_s0, 128 }
   0x2   :  { %s14_s7 = sshll.u32 %s91_s6, 4  ;;  %p44_p0 = scmp.ne.s32.totalorder %s128_s0, %s43_s10  ;;  %s15_s7 = int_to_ptr.vmem [resolvable:$true] %s14_s7 }
   0x3   :  { %p47_p1 = scmp.lt.u32.totalorder %s43_s10, %s128_s0 }
   0x5   :  { %p49_p2 = pnand %p47_p1, %p44_p0 }
   0x7   :  { %52 = shalt.err (!%p49_p2)
}
   0x8   :  { %s53_s15 = scalar_lea.vmem %s15_s7, 128  ;;  %p58_p4 = scmp.lt.s32.totalorder %s15_s7, %s15_s7 }
   0x9   :  { %p54_p3 = scmp.ne.s32.totalorder %s15_s7, %s53_s15  ;;  %p59_p5 = scmp.lt.s32.totalorder %s53_s15, %s53_s15 }
   0xb   :  { %p60_p6 = por %p59_p5, %p58_p4 }
   0xd   :  { %p61_p7 = pnand %p60_p6, %p54_p3 }
   0xf   :  { %64 = shalt.err (!%p61_p7)
}
  0x10   :  { %17 = dma.hbm_to_vmem [thread:$0]  %s128_s0, 128, %s15_s7, [#allocation3]  }
  0x11   :  { %87 = dma.done.wait [#allocation3], 128  }
  0x12   :  { %88 = vsyncadd [#allocation3], 4294967168  ;;  %v21_v0 = vld [vmem:[#allocation2] sm:$0xff]  ;;  %s92_s18 = smov 1   ;;  %s93_s19 = smov [#allocation5]  }
  0x13   :  { %22 = vrot.lane.b32.xlu0 %v21_v0, %s92_s18  ;;  %s31_s20 = sshll.u32 %s93_s19, 4  ;;  %s32_s20 = int_to_ptr.vmem [resolvable:$true] %s31_s20 }
  0x14   :  { %s65_s21 = scalar_lea.vmem %s32_s20, 128  ;;  %p70_p9 = scmp.lt.s32.totalorder %s32_s20, %s32_s20 }
  0x15   :  { %p66_p8 = scmp.ne.s32.totalorder %s32_s20, %s65_s21  ;;  %p71_p10 = scmp.lt.s32.totalorder %s65_s21, %s65_s21 }
  0x17   :  { %p72_p11 = por %p71_p10, %p70_p9 }
  0x19   :  { %p73_p12 = pnand %p72_p11, %p66_p8 }
  0x85   :  { %v23_v1 = vpop.permute.xlu0 %22 }
  0x86   :  { %24 = vst [vmem:[#allocation5] sm:$0xff] %v23_v1 }
  0x87   :  { %76 = shalt.err (!%p73_p12)
}
  0x88   :  { %s77_s0 = scalar_lea.hbm %s129_s1, 128 }
  0x89   :  { %p78_p13 = scmp.ne.s32.totalorder %s129_s1, %s77_s0  ;;  %p81_p0 = scmp.lt.u32.totalorder %s77_s0, %s129_s1 }
  0x8b   :  { %p83_p1 = pnand %p81_p0, %p78_p13 }
  0x8d   :  { %86 = shalt.err (!%p83_p1)
}
  0x8e   :  { %34 = dma.vmem_to_hbm [thread:$0]  %s32_s20, 128, %s129_s1, [#allocation4]  }
  0x8f   :  { %89 = dma.done.wait [#allocation4], 128  }
  0x90   :  { %90 = vsyncadd [#allocation4], 4294967168 }
  0x91   :  { %38 = vsyncpa [#allocation3], 1 }
  0x92   :  { %39 = vsyncpa [#allocation4], 1 }

</bundles_post_ra>
